<compile_context>
chip_gen: v5e
topology: v5e:2x2
jax: 0.10.0
libtpu: 0.0.40
codegen_flags: <defaults>
</compile_context>

<pallas_src>
import functools

import jax
import jax.numpy as jnp
from jax.experimental import pallas as pl
from jax.experimental.pallas import tpu as pltpu


def _se_kernel(x_ref, w1_ref, b1_ref, w2_ref, b2_ref, o_ref, *, inv_hw):
    """Fused SE block for a block of Bt batch elements.

    x_ref:  (Bt, C, HWp)  activations, spatially flattened (zero padded)
    w1_ref: (Cr, C)       first Linear weight  (PyTorch layout: out x in)
    b1_ref: (1, Cr)       first Linear bias (row)
    w2_ref: (C, Cr)       second Linear weight
    b2_ref: (1, C)        second Linear bias (row)
    o_ref:  (Bt, C, HWp)
    """
    x = x_ref[...]                                              # (Bt, C, HWp)

    # Global average pool over the spatial (lane) axis.  Zero padding of the
    # spatial axis does not change the sum, so dividing by the true H*W is
    # exact.
    pooled = jnp.sum(x, axis=-1) * inv_hw                       # (Bt, C)

    # fc1 + ReLU, batched over Bt (contract channel axis against w1's "in").
    h = jax.lax.dot_general(
        pooled, w1_ref[...], (((1,), (1,)), ((), ())),
        preferred_element_type=jnp.float32)                     # (Bt, Cr)
    h = jnp.maximum(h + b1_ref[...], 0.0)

    # fc2 + clamp(0, 1).
    y = jax.lax.dot_general(
        h, w2_ref[...], (((1,), (1,)), ((), ())),
        preferred_element_type=jnp.float32)                     # (Bt, C)
    y = jnp.clip(y + b2_ref[...], 0.0, 1.0)

    # Per-(batch, channel) gate, broadcast across the spatial lanes.
    o_ref[...] = (x * y[:, :, None]).astype(o_ref.dtype)


def _choose_bt(B, bytes_per_batch_elem, target_tile_bytes=2 * 1024 * 1024):
    """Largest Bt dividing B with x-tile <= ~target, keeping >=2 grid steps."""
    bt = max(1, min(B, target_tile_bytes // max(bytes_per_batch_elem, 1)))
    if B > 1:
        # Keep at least two "parallel" grid steps so both v7x TCs get work.
        bt = min(bt, (B + 1) // 2)
    bt = max(int(bt), 1)
    while B % bt != 0:   # uniform blocks only
        bt -= 1
    return max(bt, 1)


def se_forward(x_nchw, params):
    """SELayer.forward. x_nchw: (B, C, H, W) f32. Returns (B, C, H, W)."""
    B, C, H, W = x_nchw.shape
    hw = H * W
    hw_pad = ((hw + 127) // 128) * 128          # lane-dense last dimension
    w1, b1, w2, b2 = params["w1"], params["b1"], params["w2"], params["b2"]
    Cr = w1.shape[0]

    # Contiguous flatten of the spatial dims; zero-pad to a multiple of 128
    # lanes so stores are unmasked lane-dense vst (7x7 / 14x14 cases).
    x2 = x_nchw.reshape(B, C, hw)
    if hw_pad != hw:
        x2 = jnp.pad(x2, ((0, 0), (0, 0), (0, hw_pad - hw)))

    bytes_per_b = C * hw_pad * 4
    Bt = _choose_bt(B, bytes_per_b)
    steps = B // Bt

    # VMEM budget: double-buffered input + output tiles, plus (tiny) weights.
    tile_bytes = Bt * bytes_per_b
    weight_bytes = 4 * (w1.size + b1.size + w2.size + b2.size)
    vmem_need = 4 * tile_bytes + 2 * weight_bytes + (1 << 20)
    vmem_limit = int(min(max(vmem_need, 32 << 20), 48 << 20))

    kernel = functools.partial(_se_kernel, inv_hw=1.0 / hw)

    out = pl.pallas_call(
        kernel,
        out_shape=jax.ShapeDtypeStruct((B, C, hw_pad), jnp.float32),
        grid_spec=pltpu.PrefetchScalarGridSpec(
            num_scalar_prefetch=0,
            grid=(steps,),
            in_specs=[
                pl.BlockSpec((Bt, C, hw_pad), lambda b: (b, 0, 0)),
                pl.BlockSpec((Cr, C), lambda b: (0, 0)),
                pl.BlockSpec((1, Cr), lambda b: (0, 0)),
                pl.BlockSpec((C, Cr), lambda b: (0, 0)),
                pl.BlockSpec((1, C), lambda b: (0, 0)),
            ],
            out_specs=pl.BlockSpec((Bt, C, hw_pad), lambda b: (b, 0, 0)),
        ),
        input_output_aliases={0: 0},
        compiler_params=pltpu.CompilerParams(
            dimension_semantics=("parallel",),
            vmem_limit_bytes=vmem_limit),
    )(x2, w1, b1, w2, b2)

    if hw_pad != hw:
        out = out[:, :, :hw]
    return out.reshape(B, C, H, W)


def _init_params(key, channel, reduction=4):
    """Deterministic params matching PyTorch nn.Linear layouts/init scale."""
    cr = channel // reduction
    k1, k2, k3, k4 = jax.random.split(key, 4)
    bound1 = 1.0 / jnp.sqrt(channel)
    bound2 = 1.0 / jnp.sqrt(cr)
    w1 = jax.random.uniform(k1, (cr, channel), jnp.float32, -bound1, bound1)
    b1 = jax.random.uniform(k2, (1, cr), jnp.float32, -bound1, bound1)
    w2 = jax.random.uniform(k3, (channel, cr), jnp.float32, -bound2, bound2)
    b2 = jax.random.uniform(k4, (1, channel), jnp.float32, -bound2, bound2)
    return dict(w1=w1, b1=b1, w2=w2, b2=b2)


def _reference(x, params):
    """Pure-JAX reference of SELayer.forward for correctness checking."""
    pooled = jnp.mean(x, axis=(2, 3))                          # (B, C)
    h = jnp.maximum(pooled @ params["w1"].T + params["b1"], 0.0)
    y = h @ params["w2"].T + params["b2"]
    y = jnp.clip(y, 0.0, 1.0)
    return x * y[:, :, None, None]


if __name__ == "__main__":
    REDUCTION = 4
    root = jax.random.PRNGKey(0)
    kx, kp, kx2 = jax.random.split(root, 3)

    # Primary shape: lane-dense H*W (256).
    B, C, H, W = 2, 64, 16, 16
    x = jax.random.normal(kx, (B, C, H, W), jnp.float32)
    params = _init_params(kp, C, REDUCTION)

    out = se_forward(x, params)
    jax.block_until_ready(out)
    assert out.shape == (B, C, H, W)
    ref = _reference(x, params)
    assert jnp.allclose(out, ref, rtol=1e-4, atol=1e-4), "mismatch vs ref"

    # Secondary check: non-128-multiple spatial size (exercises padding path).
    xb = jax.random.normal(kx2, (B, C, 14, 14), jnp.float32)
    outb = se_forward(xb, params)
    jax.block_until_ready(outb)
    refb = _reference(xb, params)
    assert jnp.allclose(outb, refb, rtol=1e-4, atol=1e-4), "mismatch (padded)"

    print("KERNEL_OK")
</pallas_src>

<mosaic_0001>
module attributes {stable_mosaic.version = 11 : i64} {
  func.func @_se_kernel(%arg0: i32, %arg1: memref<1x64x256xf32, #tpu.memory_space<vmem>>, %arg2: memref<16x64xf32, #tpu.memory_space<vmem>>, %arg3: memref<1x16xf32, #tpu.memory_space<vmem>>, %arg4: memref<64x16xf32, #tpu.memory_space<vmem>>, %arg5: memref<1x64xf32, #tpu.memory_space<vmem>>, %arg6: memref<1x64x256xf32, #tpu.memory_space<vmem>>) attributes {dimension_semantics = [#tpu.dimension_semantics<parallel>], iteration_bounds = array<i64: 2>, scalar_prefetch = 0 : i64, scratch_operands = 0 : i64, tpu.core_type = #tpu.core_type<tc>, window_params = [{transform_indices = @transform_0, window_bounds = array<i64: 1, 64, 256>}, {pipeline_mode = #tpu.pipeline_mode<synchronous>, transform_indices = @transform_1, window_bounds = array<i64: 16, 64>}, {pipeline_mode = #tpu.pipeline_mode<synchronous>, transform_indices = @transform_2, window_bounds = array<i64: 1, 16>}, {pipeline_mode = #tpu.pipeline_mode<synchronous>, transform_indices = @transform_3, window_bounds = array<i64: 64, 16>}, {pipeline_mode = #tpu.pipeline_mode<synchronous>, transform_indices = @transform_4, window_bounds = array<i64: 1, 64>}, {transform_indices = @transform_5, window_bounds = array<i64: 1, 64, 256>}]} {
    %c0 = arith.constant 0 : index
    %c0_0 = arith.constant 0 : index
    %c0_1 = arith.constant 0 : index
    %0 = vector.load %arg1[%c0, %c0_0, %c0_1] : memref<1x64x256xf32, #tpu.memory_space<vmem>>, vector<1x64x256xf32>
    %cst = arith.constant dense<0.000000e+00> : vector<1x64xf32>
    %1 = vector.multi_reduction <add>, %0, %cst [2] : vector<1x64x256xf32> to vector<1x64xf32>
    %cst_2 = arith.constant 3.906250e-03 : f32
    %2 = vector.broadcast %cst_2 : f32 to vector<1x64xf32>
    %3 = arith.mulf %1, %2 : vector<1x64xf32>
    %c0_3 = arith.constant 0 : index
    %c0_4 = arith.constant 0 : index
    %4 = vector.load %arg2[%c0_3, %c0_4] : memref<16x64xf32, #tpu.memory_space<vmem>>, vector<16x64xf32>
    %cst_5 = arith.constant dense<0.000000e+00> : vector<1x16xf32>
    %5 = tpu.matmul %3, %4, %cst_5 {dimension_numbers = #tpu.dot_dimension_numbers<[1], [1], [0], [0], [0, 0, 1, 0], [], []>} : vector<1x64xf32>, vector<16x64xf32>, vector<1x16xf32> -> vector<1x16xf32>
    %c0_6 = arith.constant 0 : index
    %c0_7 = arith.constant 0 : index
    %6 = vector.load %arg3[%c0_6, %c0_7] : memref<1x16xf32, #tpu.memory_space<vmem>>, vector<1x16xf32>
    %7 = arith.addf %5, %6 : vector<1x16xf32>
    %cst_8 = arith.constant 0.000000e+00 : f32
    %8 = vector.broadcast %cst_8 : f32 to vector<1x16xf32>
    %9 = arith.maximumf %7, %8 : vector<1x16xf32>
    %c0_9 = arith.constant 0 : index
    %c0_10 = arith.constant 0 : index
    %10 = vector.load %arg4[%c0_9, %c0_10] : memref<64x16xf32, #tpu.memory_space<vmem>>, vector<64x16xf32>
    %cst_11 = arith.constant dense<0.000000e+00> : vector<1x64xf32>
    %11 = tpu.matmul %9, %10, %cst_11 {dimension_numbers = #tpu.dot_dimension_numbers<[1], [1], [0], [0], [0, 0, 1, 0], [], []>} : vector<1x16xf32>, vector<64x16xf32>, vector<1x64xf32> -> vector<1x64xf32>
    %c0_12 = arith.constant 0 : index
    %c0_13 = arith.constant 0 : index
    %12 = vector.load %arg5[%c0_12, %c0_13] : memref<1x64xf32, #tpu.memory_space<vmem>>, vector<1x64xf32>
    %13 = arith.addf %11, %12 : vector<1x64xf32>
    %cst_14 = arith.constant 0.000000e+00 : f32
    %cst_15 = arith.constant 1.000000e+00 : f32
    %14 = vector.broadcast %cst_14 : f32 to vector<1x64xf32>
    %15 = arith.maximumf %14, %13 : vector<1x64xf32>
    %16 = vector.broadcast %cst_15 : f32 to vector<1x64xf32>
    %17 = arith.minimumf %16, %15 : vector<1x64xf32>
    %18 = vector.shape_cast %17 : vector<1x64xf32> to vector<1x64x1xf32>
    %19 = vector.broadcast %18 : vector<1x64x1xf32> to vector<1x64x256xf32>
    %20 = arith.mulf %0, %19 : vector<1x64x256xf32>
    %c0_16 = arith.constant 0 : index
    %c0_17 = arith.constant 0 : index
    %c0_18 = arith.constant 0 : index
    %21 = vector.load %arg6[%c0_16, %c0_17, %c0_18] : memref<1x64x256xf32, #tpu.memory_space<vmem>>, vector<1x64x256xf32>
    tpu.vector_store %arg6[%c0_16, %c0_17, %c0_18], %20 {strides = array<i32>} : memref<1x64x256xf32, #tpu.memory_space<vmem>>, vector<1x64x256xf32>,
    return
  }
  func.func @transform_0(%arg0: i32) -> (i32, i32, i32) {
    %c0_i32 = arith.constant 0 : i32
    %c0_i32_0 = arith.constant 0 : i32
    %c0_i32_1 = arith.constant 0 : i32
    return %arg0, %c0_i32, %c0_i32_0 : i32, i32, i32
  }
  func.func @transform_1(%arg0: i32) -> (i32, i32) {
    %c0_i32 = arith.constant 0 : i32
    %c0_i32_0 = arith.constant 0 : i32
    %c0_i32_1 = arith.constant 0 : i32
    return %c0_i32, %c0_i32_0 : i32, i32
  }
  func.func @transform_2(%arg0: i32) -> (i32, i32) {
    %c0_i32 = arith.constant 0 : i32
    %c0_i32_0 = arith.constant 0 : i32
    %c0_i32_1 = arith.constant 0 : i32
    return %c0_i32, %c0_i32_0 : i32, i32
  }
  func.func @transform_3(%arg0: i32) -> (i32, i32) {
    %c0_i32 = arith.constant 0 : i32
    %c0_i32_0 = arith.constant 0 : i32
    %c0_i32_1 = arith.constant 0 : i32
    return %c0_i32, %c0_i32_0 : i32, i32
  }
  func.func @transform_4(%arg0: i32) -> (i32, i32) {
    %c0_i32 = arith.constant 0 : i32
    %c0_i32_0 = arith.constant 0 : i32
    %c0_i32_1 = arith.constant 0 : i32
    return %c0_i32, %c0_i32_0 : i32, i32
  }
  func.func @transform_5(%arg0: i32) -> (i32, i32, i32) {
    %c0_i32 = arith.constant 0 : i32
    %c0_i32_0 = arith.constant 0 : i32
    %c0_i32_1 = arith.constant 0 : i32
    return %arg0, %c0_i32, %c0_i32_0 : i32, i32, i32
  }
}

</mosaic_0001>

<bundles_post_ra>
// kernel: tpu_custom_call.1
= control target key start
LH: loop header
LB: loop body
LE: loop exit
PB: predicated region body
PF: predicated region fallthrough
CT: control target
= control target key end

     0   :  { %10 = vsyncpa [#allocation3], 0  ;;  %s1077_s0 = inlined_call_operand.hbm [shape: f32[2,64,256], index: 0, kind: input, shape index: {}, may-alias: {0,5}]   ;;  %s1078_s1 = inlined_call_operand.vmem [shape: f32[16,64], index: 1, kind: input, shape index: {}]   ;;  %s1079_s2 = inlined_call_operand.vmem [shape: f32[1,16], index: 2, kind: input, shape index: {}]   ;;  %s1080_s3 = inlined_call_operand.vmem [shape: f32[64,16], index: 3, kind: input, shape index: {}]   ;;  %s1081_s4 = inlined_call_operand.vmem [shape: f32[1,64], index: 4, kind: input, shape index: {}]   ;;  %s1082_s5 = inlined_call_operand.hbm [shape: f32[2,64,256], index: 5, kind: output, shape index: {}, may-alias: {0,5}]  }
   0x1   :  { %12 = vsyncpa [#allocation3 + $0x1], 0 }
   0x2   :  { %13 = vsyncpa [#allocation4], 0 }
   0x3   :  { %15 = vsyncpa [#allocation4 + $0x1], 0  ;;  %s813_s18 = smov 0   ;;  %s815_s19 = smov 0  }
   0x4   :  { %s817_s20 = smov 0   ;;  %s819_s21 = smov 0  }
   0x5 LB: > { %s834_s22 = sadd.s32 4294967295, %s777_s21   ;;  %s594_s23 = sadd.s32 4294967294, %s777_s21   ;;  %s777_s21 = sphi %s819_s21, %s1092_s21   ;;  %s773_s20 = sphi %s817_s20, %s1091_s20   ;;  %s769_s19 = sphi %s815_s19, %s1090_s19   ;;  %s765_s18 = sphi %s813_s18, %s1089_s18  }
   0x6   : > { %s838_s24 = sadd.s32 1, %s777_s21   ;;  %s28_s25 = sadd.s32 1, %s773_s20 }
   0x7   : > { %s25_s26 = ssub.s32 %s777_s21, %s838_s24  ;;  %p35_p0 = scmp.ne.s32.totalorder %s773_s20, %s769_s19 }
   0x8   : > { %p26_p1 = scmp.eq.s32.totalorder %s25_s26, 0  ;;  %p36_p2 = scmp.eq.s32.totalorder %s777_s21, 0 }
   0x9   : > { %p41_p3 = scmp.ne.s32.totalorder %s769_s19, %s765_s18  ;;  %p42_p4 = scmp.eq.s32.totalorder %s834_s22, 0 }
   0xa   : > { %s850_s27 = scalar_select %p26_p1, %s773_s20, %s28_s25  }
   0xb   : > { %p852_p5 = por %p36_p2, %p35_p0  ;;  %p856_p6 = por %p42_p4, %p41_p3 }
   0xc   : > { %p149_p7 = scmp.eq.s32.totalorder %s834_s22, 1  ;;  %p155_p8 = scmp.eq.s32.totalorder %s594_s23, 1 }
   0xd   : > { %p634_p10 = scmp.lt.s32.totalorder %s777_s21, 2  ;;  %s187_s7 = sand.u32 1, %s773_s20  }
   0xe   : > { %p863_p11 = por %p149_p7, %p35_p0  ;;  %p867_p12 = por %p155_p8, %p41_p3 }
   0xf   : > { %s620_s8 = sshll.u32 %s777_s21, 7  ;;  %s597_s9 = sshll.u32 %s187_s7, 7 }
  0x10   : > { %s196_s12 = scalar_lea.hbm %s1077_s0, %s620_s8  ;;  %s191_s14 = scalar_lea.vmem [#allocation2], %s597_s9 }
  0x11   : > { %s197_s13 = sshll.u32 %s196_s12, 4  ;;  %s199_s15 = sshll.u32 %s191_s14, 4  ;;  %s198_s13 = int_to_ptr.hbm [resolvable:$true] %s197_s13  ;;  %s200_s15 = int_to_ptr.vmem [resolvable:$true] %s199_s15 }
  0x12   : > { %p878_p13 = pnand %p634_p10, %p852_p5  ;;  %p600_p0 = scmp.ge.s32.totalorder %s777_s21, 1 }
  0x13   : > { %p207_p1 = scmp.lt.s32.totalorder %s777_s21, 3  ;;  %s188_s17 = scalar_lea.sflag [#allocation3], %s187_s7 }
  0x14   : > { %s681_s23 = sshra.s32 %s198_s13, 4  ;;  %p685_p3 = pneg %p878_p13  ;;  %s682_s23 = int_to_ptr.hbm [resolvable:$true] %s681_s23 }
  0x15   : > { %s683_s25 = scalar_lea.hbm %s682_s23, 128  ;;  %s688_s28 = scalar_lea.hbm %s1077_s0, 256 }
  0x16   : > { %p684_p2 = scmp.ne.s32.totalorder %s682_s23, %s683_s25  ;;  %p689_p5 = scmp.lt.s32.totalorder %s682_s23, %s1077_s0 }
  0x17   : > { %p690_p8 = scmp.lt.s32.totalorder %s688_s28, %s683_s25 }
  0x18   : > { %p686_p4 = pnand %p685_p3, %p684_p2 }
  0x19   : > { %p691_p10 = por %p690_p8, %p689_p5 }
  0x1a   : > { %p687_p7 = pneg %p686_p4 }
  0x1c   : > { %p692_p9 = pnand %p691_p10, %p687_p7 }
  0x1e   : > { %695 = shalt.err (!%p692_p9)
}
  0x1f   : > { %s779_s7 = smov 256   ;;  %s780_s11 = smov 16  }
  0x20   : > { %629 = dma.hbm_to_vmem [thread:$0]  (!%p878_p13), %s198_s13, 2048, %s200_s15, %s188_s17, %s779_s7, %s779_s7, %s780_s11  }
  0x21   : > { %p208_p2 = pnand %p600_p0, %p207_p1 }
  0x22   : > { %s899_s12 = sand.u32 (!%p208_p2), 1, %s769_s19  }
  0x23   : > { %211 = sbr.rel (%p208_p2) target bundleno = 600 (0x258), region = 40  ;;  %s601_s14 = sshll.u32 (!%p208_p2), %s899_s12, 7 }
  0x24   : > { %s214_s23 = scalar_lea.sflag (!%p208_p2), [#allocation3], %s899_s12  ;;  %s217_s25 = scalar_lea.vmem (!%p208_p2), [#allocation2], %s601_s14 }
  0x28   : > { %756 = dma.done.wait (%p856_p6), %s214_s23, 2048  }
  0x29   : > { %758 = vsyncadd (%p856_p6), %s214_s23, 4294965248  ;;  %v909_v0 = vld [vmem:[%s217_s25] sm:$0xff]  ;;  %v911_v1 = vld [vmem:[%s217_s25 + $0x8] sm:$0xff]  ;;  %vm335_vm0 = vcmask 523264   ;;  %vm374_vm1 = vcmask 130048   ;;  %v304_v29 = vlaneseq  ;;  %vm309_vm2 = vcmask 130112  }
  0x2a   : > { %v913_v2 = vld [vmem:[%s217_s25 + $0x20] sm:$0xff]  ;;  %v261_v3 = vadd.f32 %v911_v1, %v909_v0  ;;  %v917_v4 = vld [vmem:[%s217_s25 + $0x28] sm:$0xff]  ;;  %v927_v9 = vld [vmem:[%s217_s25 + $0x10] sm:$0xff]  ;;  %vm313_vm3 = vcmask 195712   ;;  %vm317_vm4 = vcmask 261312   ;;  %vm321_vm5 = vcmask 326912  }
  0x2b   : > { %v919_v5 = vld [vmem:[%s217_s25 + $0x40] sm:$0xff]  ;;  %v921_v6 = vld [vmem:[%s217_s25 + $0x48] sm:$0xff]  ;;  %v267_v7 = vadd.f32 %v917_v4, %v913_v2  ;;  %v929_v10 = vld [vmem:[%s217_s25 + $0x18] sm:$0xff]  ;;  %v305_v34 = vand.u32 127, %v304_v29  ;;  %vm325_vm6 = vcmask 392512   ;;  %vm329_vm7 = vcmask 458112  }
  0x2c   : > { %v273_v8 = vadd.f32 %v921_v6, %v919_v5  ;;  %262 = vadd.xlane.f32.xlu0 %v261_v3  ;;  %v931_v11 = vld [vmem:[%s217_s25 + $0x30] sm:$0xff]  ;;  %v933_v12 = vld [vmem:[%s217_s25 + $0x38] sm:$0xff]  ;;  %v264_v15 = vadd.f32 %v929_v10, %v927_v9  ;;  %v945_v18 = vld [vmem:[%s217_s25 + $0x60] sm:$0xff]  ;;  %vm333_vm8 = vcmask 523712   ;;  %s1011_s7 = scalar_lea.vmem [#allocation5], %s601_s14  ;;  %s621_s14 = sshll.u32 %s834_s22, 7 }
  0x2d   : > { %268 = vadd.xlane.f32.xlu1 %v267_v7  ;;  %v935_v13 = vld [vmem:[%s217_s25 + $0x50] sm:$0xff]  ;;  %v937_v14 = vld [vmem:[%s217_s25 + $0x58] sm:$0xff]  ;;  %v270_v16 = vadd.f32 %v933_v12, %v931_v11  ;;  %v947_v19 = vld [vmem:[%s217_s25 + $0x68] sm:$0xff]  ;;  %v307_v37 = vadd.s32 4294967288, %v305_v34  ;;  %v311_v38 = vadd.s32 4294967280, %v305_v34  ;;  %v315_v41 = vadd.s32 4294967272, %v305_v34 }
  0x2e   : > { %274 = vadd.xlane.f32.xlu2 %v273_v8  ;;  %v276_v17 = vadd.f32 %v937_v14, %v935_v13  ;;  %v949_v20 = vld [vmem:[%s217_s25 + $0x70] sm:$0xff]  ;;  %v951_v21 = vld [vmem:[%s217_s25 + $0x78] sm:$0xff]  ;;  %v279_v22 = vadd.f32 %v947_v19, %v945_v18  ;;  %v294_v24 = vld [vmem:[%s1078_s1 + $0x8] sm:$0xff]  ;;  %v319_v46 = vadd.s32 4294967264, %v305_v34  ;;  %v323_v53 = vadd.s32 4294967256, %v305_v34  ;;  %s517_s25 = scalar_lea.hbm %s1082_s5, %s621_s14  ;;  %s518_s29 = sshll.u32 %s1011_s7, 4  ;;  %s519_s29 = int_to_ptr.vmem [resolvable:$true] %s518_s29 }
  0x2f   : > { %v282_v23 = vadd.f32 %v951_v21, %v949_v20  ;;  %603 = vmatpush.xpose.msk.msra.mxu0 %vm335_vm0, %v294_v24  ;;  %v293_v25 = vld [vmem:[%s1078_s1] sm:$0xff]  ;;  %v372_v26 = vld [vmem:[%s1080_s3 + $0x38] sm:$0xff]  ;;  %v371_v27 = vld [vmem:[%s1080_s3 + $0x30] sm:$0xff]  ;;  %v327_v60 = vadd.s32 4294967248, %v305_v34  ;;  %v331_v63 = vadd.s32 4294967240, %v305_v34  ;;  %s520_s13 = sshll.u32 %s517_s25, 4  ;;  %s521_s13 = int_to_ptr.hbm [resolvable:$true] %s520_s13 }
  0x30   : > { %606 = vmatpush.xpose.msk.msra.mxu1 %vm374_vm1, %v372_v26  ;;  %v370_v28 = vld [vmem:[%s1080_s3 + $0x28] sm:$0xff]  ;;  %v369_v33 = vld [vmem:[%s1080_s3 + $0x20] sm:$0xff]  ;;  %v368_v35 = vld [vmem:[%s1080_s3 + $0x18] sm:$0xff]  ;;  %s506_s22 = scalar_lea.sflag [#allocation4], %s899_s12  ;;  %s725_s15 = sshra.s32 %s521_s13, 4  ;;  %s726_s15 = int_to_ptr.hbm [resolvable:$true] %s725_s15 }
  0x31   : > { %v367_v45 = vld [vmem:[%s1080_s3 + $0x10] sm:$0xff]  ;;  %v366_v56 = vld [vmem:[%s1080_s3 + $0x8] sm:$0xff]  ;;  %v295_v26 = vld [vmem:[%s1079_s2] sm:$0x1]  ;;  %s727_s16 = scalar_lea.hbm %s726_s15, 128  ;;  %s731_s8 = scalar_lea.hbm %s1082_s5, 256 }
  0x32   : > { %p728_p6 = scmp.ne.s32.totalorder %s726_s15, %s727_s16  ;;  %p732_p0 = scmp.lt.s32.totalorder %s726_s15, %s1082_s5 }
  0x33   : > { %604 = vmatpush.xpose.msk.msra.mxu0 %vm335_vm0, %v293_v25  ;;  %v365_v25 = vld [vmem:[%s1080_s3] sm:$0xff]  ;;  %p733_p1 = scmp.lt.s32.totalorder %s731_s8, %s727_s16 }
  0x34   : > { %265 = vadd.xlane.f32.xlu0 %v264_v15  ;;  %607 = vmatpush.xpose.msk.msra.mxu1 %vm374_vm1, %v371_v27  ;;  %p729_p9 = pnand %p728_p6, %p863_p11 }
  0x35   : > { %271 = vadd.xlane.f32.xlu1 %v270_v16  ;;  %p734_p3 = por %p733_p1, %p732_p0 }
  0x36   : > { %277 = vadd.xlane.f32.xlu2 %v276_v17  ;;  %p730_p13 = pneg %p729_p9 }
  0x38   : > { %608 = vmatpush.xpose.msk.msra.mxu1 %vm374_vm1, %v370_v28  ;;  %p735_p4 = pnand %p734_p3, %p730_p13 }
  0x3c   : > { %280 = vadd.xlane.f32.xlu0 %v279_v22  ;;  %609 = vmatpush.xpose.msk.msra.mxu1 %vm374_vm1, %v369_v33 }
  0x3d   : > { %283 = vadd.xlane.f32.xlu1 %v282_v23 }
  0x40   : > { %610 = vmatpush.xpose.msk.msra.mxu1 %vm374_vm1, %v368_v35 }
  0x44   : > { %611 = vmatpush.xpose.msk.msra.mxu1 %vm374_vm1, %v367_v45 }
  0x48   : > { %612 = vmatpush.xpose.msk.msra.mxu1 %vm374_vm1, %v366_v56 }
  0x4c   : > { %613 = vmatpush.xpose.msk.msra.mxu1 %vm374_vm1, %v365_v25 }
  0x9f   : > { %v263_v30 = vpop.xlane.xlu0 %262 }
  0xa0   : > { %v269_v31 = vpop.xlane.xlu1 %268  ;;  %v285_v36 = vmul.f32 0.00390625, %v263_v30 }
  0xa1   : > { %v275_v32 = vpop.xlane.xlu2 %274  ;;  %v287_v39 = vmul.f32 0.00390625, %v269_v31  ;;  %v426_v31 = vshrl.u32 %v304_v29, 7 }
  0xa2   : > { %v306_v48 = vperm.slane %v285_v36, %v305_v34  ;;  %v289_v49 = vmul.f32 0.00390625, %v275_v32  ;;  %v373_v34 = vld [vmem:[%s1081_s4] sm:$0x1] }
  0xa3   : > { %v312_v51 = vperm.slane %v287_v39, %v311_v38  ;;  %672 = vset.pattern.permute.xlu2 %v426_v31  ;;  %v439_v32 = vadd.s32 16, %v426_v31  ;;  %v433_v33 = vadd.s32 8, %v426_v31  ;;  %v469_v29 = vadd.s32 56, %v426_v31 }
  0xa4   : > { %v320_v58 = vperm.slane %v289_v49, %v319_v46 }
  0xa5   : > { %674 = vset.pattern.permute.xlu1 %v439_v32  ;;  %673 = vset.pattern.permute.xlu0 %v433_v33 }
  0xa7   : > { %v266_v40 = vpop.xlane.xlu0 %265 }
  0xa8   : > { %v286_v42 = vmul.f32 0.00390625, %v266_v40  ;;  %v272_v43 = vpop.xlane.xlu1 %271  ;;  %v457_v40 = vadd.s32 40, %v426_v31 }
  0xa9   : > { %v278_v44 = vpop.xlane.xlu2 %277  ;;  %v288_v47 = vmul.f32 0.00390625, %v272_v43  ;;  %v463_v43 = vadd.s32 48, %v426_v31 }
  0xaa   : > { %v308_v50 = vperm.slane %v286_v42, %v307_v37  ;;  %v290_v54 = vmul.f32 0.00390625, %v278_v44  ;;  %v451_v42 = vadd.s32 32, %v426_v31 }
  0xab   : > { %v316_v52 = vperm.slane %v288_v47, %v315_v41  ;;  %v445_v41 = vadd.s32 24, %v426_v31 }
  0xac   : > { %v310_v55 = vsel %vm309_vm2, %v308_v50, %v306_v48  ;;  %v324_v61 = vperm.slane %v290_v54, %v323_v53 }
  0xad   : > { %v314_v57 = vsel %vm313_vm3, %v312_v51, %v310_v55 }
  0xae   : > { %v318_v59 = vsel %vm317_vm4, %v316_v52, %v314_v57 }
  0xaf   : > { %v281_v62 = vpop.xlane.xlu0 %280  ;;  %v322_v8 = vsel %vm321_vm5, %v320_v58, %v318_v59 }
  0xb0   : > { %v291_v3 = vmul.f32 0.00390625, %v281_v62  ;;  %v284_v7 = vpop.xlane.xlu1 %283  ;;  %v326_v22 = vsel %vm325_vm6, %v324_v61, %v322_v8 }
  0xb1   : > { %v292_v15 = vmul.f32 0.00390625, %v284_v7 }
  0xb2   : > { %v328_v16 = vperm.slane %v291_v3, %v327_v60 }
  0xb3   : > { %v332_v17 = vperm.slane %v292_v15, %v331_v63 }
  0xb4   : > { %v330_v23 = vsel %vm329_vm7, %v328_v16, %v326_v22 }
  0xb5   : > { %v334_v24 = vsel %vm333_vm8, %v332_v17, %v330_v23 }
  0xb6   : > { %605 = vmatmul.msk.f32.vlgmr.msra.gmra.mxu0 %vm335_vm0, %v334_v24 }
 0x133   : > { %v361_v27 = vpop.f32.mrf.mxu0 }
 0x134   : > { %v362_v28 = vadd.f32 %v361_v27, %v295_v26 }
 0x136   : > { %v364_v30 = vmax.f32 %v362_v28, 0.0 }
 0x138   : > { %614 = vmatmul.msk.f32.vlgmr.msra.gmra.mxu1 %vm374_vm1, %v364_v30 }
 0x1b5   : > { %v419_v35 = vpop.f32.mrf.mxu1 }
 0x1b6   : > { %v420_v36 = vadd.f32 %v419_v35, %v373_v34 }
 0x1b8   : > { %v422_v37 = vmax.f32 %v420_v36, 0.0 }
 0x1ba   : > { %v423_v38 = vmin.f32 %v422_v37, 1.0 }
 0x1bc   : > { %v424_v39 = vperm.slane %v423_v38, 0 }
 0x1be   : > { %441 = vperm.xlu1 %674, %v424_v39   ;;  %435 = vperm.xlu0 %673, %v424_v39  }
 0x1bf   : > { %429 = vperm.xlu2 %672, %v424_v39  }
 0x1c6   : > { %677 = vset.pattern.permute.xlu1 %v457_v40  ;;  %680 = vset.pattern.permute.xlu0 %v469_v29 }
 0x1c7   : > { %675 = vset.pattern.permute.xlu2 %v445_v41 }
 0x1ce   : > { %459 = vperm.xlu1 %677, %v424_v39  }
 0x1cf   : > { %447 = vperm.xlu2 %675, %v424_v39  }
 0x1d6   : > { %679 = vset.pattern.permute.xlu1 %v469_v29 }
 0x1d7   : > { %676 = vset.pattern.permute.xlu2 %v451_v42 }
 0x1de   : > { %471 = vperm.xlu1 %679, %v424_v39  }
 0x1df   : > { %453 = vperm.xlu2 %676, %v424_v39  }
 0x1e7   : > { %678 = vset.pattern.permute.xlu2 %v463_v43 }
 0x1ef   : > { %465 = vperm.xlu2 %678, %v424_v39  }
 0x219   : > { %v430_v44 = vpop.permute.xlu2 %429 }
 0x21a   : > { %v473_v45 = vmul.f32 %v430_v44, %v909_v0  ;;  %v474_v46 = vmul.f32 %v430_v44, %v911_v1 }
 0x21c   : > { %489 = vst [vmem:[%s1011_s7] sm:$0xff] %v473_v45 }
 0x21d   : > { %490 = vst [vmem:[%s1011_s7 + $0x8] sm:$0xff] %v474_v46 }
 0x229   : > { %v448_v47 = vpop.permute.xlu2 %447 }
 0x22a   : > { %v479_v48 = vmul.f32 %v448_v47, %v931_v11  ;;  %v480_v0 = vmul.f32 %v448_v47, %v933_v12 }
 0x22c   : > { %495 = vst [vmem:[%s1011_s7 + $0x30] sm:$0xff] %v479_v48 }
 0x22d   : > { %496 = vst [vmem:[%s1011_s7 + $0x38] sm:$0xff] %v480_v0 }
 0x230   : > { %v442_v1 = vpop.permute.xlu1 %441  ;;  %v436_v49 = vpop.permute.xlu0 %435 }
 0x231   : > { %v477_v50 = vmul.f32 %v442_v1, %v913_v2  ;;  %v478_v51 = vmul.f32 %v442_v1, %v917_v4  ;;  %v475_v52 = vmul.f32 %v436_v49, %v927_v9  ;;  %v476_v53 = vmul.f32 %v436_v49, %v929_v10 }
 0x233   : > { %493 = vst [vmem:[%s1011_s7 + $0x20] sm:$0xff] %v477_v50 }
 0x234   : > { %494 = vst [vmem:[%s1011_s7 + $0x28] sm:$0xff] %v478_v51 }
 0x235   : > { %491 = vst [vmem:[%s1011_s7 + $0x10] sm:$0xff] %v475_v52 }
 0x236   : > { %492 = vst [vmem:[%s1011_s7 + $0x18] sm:$0xff] %v476_v53 }
 0x239   : > { %v454_v11 = vpop.permute.xlu2 %453 }
 0x23a   : > { %v481_v12 = vmul.f32 %v454_v11, %v919_v5  ;;  %v482_v2 = vmul.f32 %v454_v11, %v921_v6 }
 0x23c   : > { %497 = vst [vmem:[%s1011_s7 + $0x40] sm:$0xff] %v481_v12 }
 0x23d   : > { %498 = vst [vmem:[%s1011_s7 + $0x48] sm:$0xff] %v482_v2 }
 0x240   : > { %v460_v4 = vpop.permute.xlu1 %459 }
 0x241   : > { %v483_v9 = vmul.f32 %v460_v4, %v935_v13  ;;  %v484_v54 = vmul.f32 %v460_v4, %v937_v14 }
 0x243   : > { %499 = vst [vmem:[%s1011_s7 + $0x50] sm:$0xff] %v483_v9 }
 0x244   : > { %500 = vst [vmem:[%s1011_s7 + $0x58] sm:$0xff] %v484_v54 }
 0x249   : > { %v466_v10 = vpop.permute.xlu2 %465 }
 0x24a   : > { %v485_v55 = vmul.f32 %v466_v10, %v945_v18  ;;  %v486_v5 = vmul.f32 %v466_v10, %v947_v19 }
 0x24c   : > { %501 = vst [vmem:[%s1011_s7 + $0x60] sm:$0xff] %v485_v55 }
 0x24d   : > { %502 = vst [vmem:[%s1011_s7 + $0x68] sm:$0xff] %v486_v5 }
 0x250   : > { %v472_v6 = vpop.permute.xlu1 %471 }
 0x251   : > { %v487_v13 = vmul.f32 %v472_v6, %v949_v20  ;;  %v488_v14 = vmul.f32 %v472_v6, %v951_v21 }
 0x253   : > { %503 = vst [vmem:[%s1011_s7 + $0x70] sm:$0xff] %v487_v13 }
 0x254   : > { %504 = vst [vmem:[%s1011_s7 + $0x78] sm:$0xff] %v488_v14 }
 0x255   : > { %738 = shalt.err (!%p735_p4)
}
 0x256   : > { %s781_s12 = smov 256   ;;  %s782_s10 = smov 16  }
 0x257   : > { %624 = dma.vmem_to_hbm [thread:$0]  (%p863_p11), %s519_s29, 2048, %s521_s13, %s506_s22, %s781_s12, %s781_s12, %s782_s10  }
 0x258 PF: > { %s535_s7 = sand.u32 1, %s765_s18   ;;  %p1088_p7 = scmp.ge.s32.totalorder %s777_s21, 2 }
 0x259   : > { %s536_s14 = scalar_lea.sflag [#allocation4], %s535_s7 }
 0x25a   : > { %p631_p5 = pnand %p1088_p7, %p867_p12 }
 0x25c   : > { %p632_p8 = pneg %p631_p5 }
 0x25e   : > { %760 = dma.done.wait (%p632_p8), %s536_s14, 2048  }
 0x25f   : > { %762 = vsyncadd (%p632_p8), %s536_s14, 4294965248  ;;  %p18_p10 = scmp.ge.s32.totalorder %s838_s24, 4   ;;  %s1089_s18 = smov %s769_s19 }
 0x260   : > { %s1090_s19 = smov %s773_s20  ;;  %s1091_s20 = smov %s850_s27 }
 0x261   : > { %s1092_s21 = smov %s838_s24  ;;  %20 = sbr.rel (!%p18_p10) target bundleno = 5 (0x5), region = 85 }
 0x266   :  { %542 = vsyncpa [#allocation3], 1 }
 0x267   :  { %544 = vsyncpa [#allocation3 + $0x1], 1 }
 0x268   :  { %545 = vsyncpa [#allocation4], 1 }
 0x269   :  { %547 = vsyncpa [#allocation4 + $0x1], 1 }

</bundles_post_ra>
